<compile_context>
chip_gen: v5e
topology: v5e:2x2
jax: 0.10.0
libtpu: 0.0.40
codegen_flags: <defaults>
</compile_context>

<pallas_src>
import functools

import jax
import jax.numpy as jnp
from jax import lax
from jax.experimental import pallas as pl
from jax.experimental.pallas import tpu as pltpu

_LANE = 128
_VMEM_LIMIT = 32 * 1024 * 1024      # safe on v5e/v6e (128 MiB) and v7x (64 MiB)
_BLOCK_BUDGET = 20 * 1024 * 1024    # target footprint for pipelined blocks


def _round_up(x, m):
    return (x + m - 1) // m * m


def _pick_cols_tile(hw_pad, cp, in_bytes, out_bytes, max_cols=None):
    """Largest HW tile (multiple of 128, divisor of hw_pad) within the VMEM budget."""
    per_col = 2 * cp * (in_bytes + out_bytes)          # double-buffered x + out tiles
    fixed = 2 * cp * cp * (in_bytes + 4)               # W2eff / S blocks (double-buffered)
    budget = max(_BLOCK_BUDGET - fixed, 2 * 1024 * 1024)
    cap = 4096 if max_cols is None else max_cols
    max_t = max(_LANE, min(cap, (budget // per_col) // _LANE * _LANE))
    best = _LANE
    t = _LANE
    while t <= min(hw_pad, max_t):
        if hw_pad % t == 0:
            best = t
        t += _LANE
    return best


# ---------------------------------------------------------------------------
# Pass A: per (batch, chunk), accumulate S = X_c X_c^T and v = X_c @ 1 over HW
# tiles, directly into the f32 output blocks (no scratch accumulator).
# ---------------------------------------------------------------------------
def _stats_kernel(x_ref, s_ref, v_ref):
    t = pl.program_id(2)

    @pl.when(t == 0)
    def _():
        s_ref[...] = jnp.zeros_like(s_ref)
        v_ref[...] = jnp.zeros_like(v_ref)

    x = x_ref[0]                                        # (Cp, T), compute dtype
    s_ref[0, 0] += lax.dot_general(                     # X_c @ X_c^T (contract lanes)
        x, x, dimension_numbers=(((1,), (1,)), ((), ())),
        preferred_element_type=jnp.float32)
    v_ref[0, 0] += jnp.sum(x.astype(jnp.float32), axis=-1, keepdims=True)


# ---------------------------------------------------------------------------
# Pass B: per (batch, HW tile), out = W2eff^T @ x + beff   (single matmul).
# ---------------------------------------------------------------------------
def _out_kernel(x_ref, w_ref, b_ref, o_ref):
    x = x_ref[0]                                        # (Cp, T), compute dtype
    acc = jnp.dot(w_ref[0], x, preferred_element_type=jnp.float32)
    o_ref[0] = (acc + b_ref[0]).astype(o_ref.dtype)


@functools.partial(jax.jit, static_argnames=("compute_dtype", "max_cols"))
def relation_nonlocal(x_nchw, params, *, compute_dtype=None, max_cols=None):
    """params = ((w0, b0), ..., (w3, b3)); w_i: (C, C) 1x1-conv weight, b_i: (C,).

    compute_dtype: dtype of the big matmul operands (e.g. jnp.bfloat16 on
    v6e/v7x); all accumulation and the tiny weight-folding epilogue stay f32.
    """
    N, C, H, W = x_nchw.shape
    HW = H * W
    out_dtype = x_nchw.dtype
    cdt = jnp.dtype(compute_dtype) if compute_dtype is not None else jnp.dtype(out_dtype)
    isz = cdt.itemsize
    osz = jnp.dtype(out_dtype).itemsize

    sub = max(8, 32 // max(isz, 1))                     # 8 (f32) / 16 (bf16) sublanes
    c_pad = _round_up(C, sub)
    hw_pad = _round_up(HW, _LANE)

    # NCHW -> (N, C, HW) is a free reshape (no transpose).  Pad channels to the
    # sublane multiple and HW to the lane multiple only when needed.
    x = x_nchw.reshape(N, C, HW).astype(cdt)
    if c_pad != C or hw_pad != HW:
        x = jnp.pad(x, ((0, 0), (0, c_pad - C), (0, hw_pad - HW)))

    tile = _pick_cols_tile(hw_pad, c_pad, isz, osz, max_cols)
    n_tiles = hw_pad // tile

    # Split the HW reduction into 2 parallel chunks when the batch axis alone
    # cannot feed both v7x TensorCores.
    n_chunks = 2 if (N < 2 and n_tiles >= 2 and n_tiles % 2 == 0) else 1
    tpc = n_tiles // n_chunks

    # --- pass A: per-batch channel statistics --------------------------------
    s_part, v_part = pl.pallas_call(
        _stats_kernel,
        out_shape=(
            jax.ShapeDtypeStruct((N, n_chunks, c_pad, c_pad), jnp.float32),
            jax.ShapeDtypeStruct((N, n_chunks, c_pad, 1), jnp.float32),
        ),
        grid_spec=pltpu.PrefetchScalarGridSpec(
            num_scalar_prefetch=0,
            grid=(N, n_chunks, tpc),
            in_specs=[pl.BlockSpec((1, c_pad, tile),
                                   lambda n, c, t: (n, 0, c * tpc + t))],
            out_specs=(
                pl.BlockSpec((1, 1, c_pad, c_pad), lambda n, c, t: (n, c, 0, 0)),
                pl.BlockSpec((1, 1, c_pad, 1), lambda n, c, t: (n, c, 0, 0)),
            ),
        ),
        compiler_params=pltpu.CompilerParams(
            dimension_semantics=("parallel", "parallel", "arbitrary"),
            vmem_limit_bytes=_VMEM_LIMIT),
        cost_estimate=pl.CostEstimate(
            flops=2 * N * c_pad * c_pad * hw_pad,
            transcendentals=0,
            bytes_accessed=N * c_pad * hw_pad * isz
            + N * n_chunks * c_pad * (c_pad + 1) * 4),
    )(x)

    # --- tiny epilogue (O(N*C^3), f32): fold all four convs + 1/HW into
    #     W2eff^T (left-multiplies x) and beff. --------------------------------
    (w0, b0), (w1, b1), (w2, b2), (w3, b3) = [
        (jnp.asarray(w, jnp.float32), jnp.asarray(b, jnp.float32)) for w, b in params]

    S = jnp.sum(s_part, axis=1)[:, :C, :C]              # (N, C, C), symmetric
    v = jnp.sum(v_part, axis=1)[:, :C, :]                # (N, C, 1)

    w1v = jnp.einsum('ij,njk->nik', w1, v)               # W1 @ v
    w0v = jnp.einsum('ij,njk->nik', w0, v)               # W0 @ v
    #  M^T = W0 S W1^T + b0 (W1 v)^T + (W0 v) b1^T + HW * b0 b1^T
    mt = (jnp.einsum('ai,nij,bj->nab', w0, S, w1)
          + b0[None, :, None] * jnp.swapaxes(w1v, 1, 2)
          + w0v * b1[None, None, :]
          + float(HW) * (b0[:, None] * b1[None, :])[None])
    g = jnp.einsum('ij,njk->nik', w3, mt) * (1.0 / float(HW))   # W3 M^T / HW
    w2eff_t = jnp.einsum('nij,jk->nik', g, w2)                   # (N, C, C)
    beff = jnp.einsum('nij,j->ni', g, b2)[..., None] + b3[None, :, None]  # (N, C, 1)

    if c_pad != C:
        w2eff_t = jnp.pad(w2eff_t, ((0, 0), (0, c_pad - C), (0, c_pad - C)))
        beff = jnp.pad(beff, ((0, 0), (0, c_pad - C), (0, 0)))
    w2eff_t = w2eff_t.astype(cdt)
    beff = beff.astype(jnp.float32)

    # --- pass B: out_tile = W2eff^T @ x_tile + beff ---------------------------
    out_flat = pl.pallas_call(
        _out_kernel,
        out_shape=jax.ShapeDtypeStruct((N, c_pad, hw_pad), out_dtype),
        grid_spec=pltpu.PrefetchScalarGridSpec(
            num_scalar_prefetch=0,
            grid=(N, n_tiles),
            in_specs=[
                pl.BlockSpec((1, c_pad, tile), lambda n, t: (n, 0, t)),
                pl.BlockSpec((1, c_pad, c_pad), lambda n, t: (n, 0, 0)),
                pl.BlockSpec((1, c_pad, 1), lambda n, t: (n, 0, 0)),
            ],
            out_specs=pl.BlockSpec((1, c_pad, tile), lambda n, t: (n, 0, t)),
        ),
        compiler_params=pltpu.CompilerParams(
            dimension_semantics=("parallel", "parallel"),
            vmem_limit_bytes=_VMEM_LIMIT),
        cost_estimate=pl.CostEstimate(
            flops=2 * N * c_pad * c_pad * hw_pad,
            transcendentals=0,
            bytes_accessed=N * c_pad * hw_pad * (isz + osz)
            + N * c_pad * (c_pad * isz + 4)),
    )(x, w2eff_t, beff)

    out = out_flat[:, :C, :HW].reshape(N, C, H, W)
    return out.astype(out_dtype)


# ---------------------------------------------------------------------------
# Pure-JAX replica of the PyTorch forward, for verification.
# ---------------------------------------------------------------------------
def _reference(x_nchw, params):
    N, C, H, W = x_nchw.shape
    HW = H * W
    (w0, b0), (w1, b1), (w2, b2), (w3, b3) = params

    def conv1x1(x, w, b):  # NCHW, w: (Cout, Cin), b: (Cout,)
        return jnp.einsum('nchw,dc->ndhw', x, w) + b[None, :, None, None]

    f_v = jnp.transpose(conv1x1(x_nchw, w0, b0), (0, 2, 3, 1)).reshape(N, HW, C)
    f_k = jnp.transpose(conv1x1(x_nchw, w1, b1), (0, 2, 3, 1)).reshape(N, HW, C)
    f_q = jnp.transpose(conv1x1(x_nchw, w2, b2), (0, 2, 3, 1)).reshape(N, HW, C)
    w_att = jnp.matmul(f_k, jnp.transpose(f_q, (0, 2, 1))) / HW       # (N, HW, HW)
    f_r = jnp.matmul(jnp.transpose(w_att, (0, 2, 1)), f_v)            # (N, HW, C)
    f_r = jnp.transpose(f_r.reshape(N, H, W, C), (0, 3, 1, 2))        # NCHW
    return conv1x1(f_r, w3, b3)


def _init_params(key, channels):
    params = []
    for i in range(4):
        kw, kb, key = jax.random.split(jax.random.fold_in(key, i), 3)
        w = 0.1 * jax.random.normal(kw, (channels, channels), dtype=jnp.float32)
        b = 0.1 * jax.random.normal(kb, (channels,), dtype=jnp.float32)
        params.append((w, b))
    return tuple(params)


def _check(x, params, ref, atol, rtol, **kw):
    out = jax.block_until_ready(relation_nonlocal(x, params, **kw))
    assert out.shape == ref.shape, (out.shape, ref.shape)
    err = float(jnp.max(jnp.abs(out.astype(jnp.float32) - ref)))
    assert jnp.allclose(out.astype(jnp.float32), ref, atol=atol, rtol=rtol), err


if __name__ == "__main__":
    key = jax.random.PRNGKey(0)

    # Config 1: N=2, C=4, 16x16 — f32 (strict) and bf16 (loose) compute paths.
    N, C, H, W = 2, 4, 16, 16
    kx, kp = jax.random.split(key)
    x = jax.random.normal(kx, (N, C, H, W), dtype=jnp.float32)
    params = _init_params(kp, C)
    ref = jax.block_until_ready(_reference(x, params))
    _check(x, params, ref, atol=1e-4, rtol=1e-4)
    _check(x, params, ref, atol=5e-2, rtol=5e-2, compute_dtype=jnp.bfloat16)

    # Config 2: N=1, odd C, non-multiple HW, forced 128-wide tiles — exercises
    # channel/pixel padding and the chunked (2x parallel) pass-A reduction.
    N2, C2, H2, W2 = 1, 5, 10, 13
    kx2, kp2 = jax.random.split(jax.random.fold_in(key, 7))
    x2 = jax.random.normal(kx2, (N2, C2, H2, W2), dtype=jnp.float32)
    params2 = _init_params(kp2, C2)
    ref2 = jax.block_until_ready(_reference(x2, params2))
    _check(x2, params2, ref2, atol=1e-4, rtol=1e-4, max_cols=128)

    print("KERNEL_OK")
</pallas_src>

<mosaic_0001>
module attributes {stable_mosaic.version = 11 : i64} {
  func.func @_stats_kernel(%arg0: i32, %arg1: i32, %arg2: i32, %arg3: memref<1x8x256xf32, #tpu.memory_space<vmem>>, %arg4: memref<1x1x8x8xf32, #tpu.memory_space<vmem>>, %arg5: memref<1x1x8x1xf32, #tpu.memory_space<vmem>>) attributes {dimension_semantics = [#tpu.dimension_semantics<parallel>, #tpu.dimension_semantics<parallel>, #tpu.dimension_semantics<arbitrary>], iteration_bounds = array<i64: 2, 1, 1>, scalar_prefetch = 0 : i64, scratch_operands = 0 : i64, tpu.core_type = #tpu.core_type<tc>, window_params = [{transform_indices = @transform_0, window_bounds = array<i64: 1, 8, 256>}, {transform_indices = @transform_1, window_bounds = array<i64: 1, 1, 8, 8>}, {transform_indices = @transform_2, window_bounds = array<i64: 1, 1, 8, 1>}]} {
    %c0_i32 = arith.constant 0 : i32
    %0 = arith.cmpi eq, %arg2, %c0_i32 : i32
    %1 = arith.extui %0 : i1 to i32
    %c0_i32_0 = arith.constant 0 : i32
    %2 = arith.cmpi ne, %1, %c0_i32_0 : i32
    scf.if %2 {
      %cst_20 = arith.constant 0.000000e+00 : f32
      %20 = vector.broadcast %cst_20 : f32 to vector<1x1x8x8xf32>
      %c0_21 = arith.constant 0 : index
      %c0_22 = arith.constant 0 : index
      %c0_23 = arith.constant 0 : index
      %c0_24 = arith.constant 0 : index
      %21 = vector.load %arg4[%c0_21, %c0_22, %c0_23, %c0_24] : memref<1x1x8x8xf32, #tpu.memory_space<vmem>>, vector<1x1x8x8xf32>
      tpu.vector_store %arg4[%c0_21, %c0_22, %c0_23, %c0_24], %20 {strides = array<i32>} : memref<1x1x8x8xf32, #tpu.memory_space<vmem>>, vector<1x1x8x8xf32>,
      %cst_25 = arith.constant 0.000000e+00 : f32
      %22 = vector.broadcast %cst_25 : f32 to vector<1x1x8x1xf32>
      %c0_26 = arith.constant 0 : index
      %c0_27 = arith.constant 0 : index
      %c0_28 = arith.constant 0 : index
      %c0_29 = arith.constant 0 : index
      %23 = vector.load %arg5[%c0_26, %c0_27, %c0_28, %c0_29] : memref<1x1x8x1xf32, #tpu.memory_space<vmem>>, vector<1x1x8x1xf32>
      tpu.vector_store %arg5[%c0_26, %c0_27, %c0_28, %c0_29], %22 {strides = array<i32>} : memref<1x1x8x1xf32, #tpu.memory_space<vmem>>, vector<1x1x8x1xf32>,
    } else {
    }
    %c0 = arith.constant 0 : index
    %c0_1 = arith.constant 0 : index
    %c0_2 = arith.constant 0 : index
    %3 = vector.load %arg3[%c0, %c0_1, %c0_2] : memref<1x8x256xf32, #tpu.memory_space<vmem>>, vector<1x8x256xf32>
    %4 = vector.shape_cast %3 : vector<1x8x256xf32> to vector<8x256xf32>
    %c0_3 = arith.constant 0 : index
    %c0_4 = arith.constant 0 : index
    %c0_5 = arith.constant 0 : index
    %c0_6 = arith.constant 0 : index
    %5 = vector.load %arg4[%c0_3, %c0_4, %c0_5, %c0_6] : memref<1x1x8x8xf32, #tpu.memory_space<vmem>>, vector<1x1x8x8xf32>
    %6 = vector.shape_cast %5 : vector<1x1x8x8xf32> to vector<8x8xf32>
    %cst = arith.constant dense<0.000000e+00> : vector<8x8xf32>
    %7 = tpu.matmul %4, %4, %cst {dimension_numbers = #tpu.dot_dimension_numbers<[1], [1], [0], [0], [0, 0, 1, 0], [], []>} : vector<8x256xf32>, vector<8x256xf32>, vector<8x8xf32> -> vector<8x8xf32>
    %8 = arith.addf %6, %7 : vector<8x8xf32>
    %c0_7 = arith.constant 0 : index
    %c0_8 = arith.constant 0 : index
    %c0_9 = arith.constant 0 : index
    %c0_10 = arith.constant 0 : index
    %9 = vector.load %arg4[%c0_7, %c0_8, %c0_9, %c0_10] : memref<1x1x8x8xf32, #tpu.memory_space<vmem>>, vector<1x1x8x8xf32>
    %10 = vector.shape_cast %9 : vector<1x1x8x8xf32> to vector<8x8xf32>
    %11 = vector.shape_cast %8 : vector<8x8xf32> to vector<1x1x8x8xf32>
    tpu.vector_store %arg4[%c0_7, %c0_8, %c0_9, %c0_10], %11 {strides = array<i32>} : memref<1x1x8x8xf32, #tpu.memory_space<vmem>>, vector<1x1x8x8xf32>,
    %c0_11 = arith.constant 0 : index
    %c0_12 = arith.constant 0 : index
    %c0_13 = arith.constant 0 : index
    %c0_14 = arith.constant 0 : index
    %12 = vector.load %arg5[%c0_11, %c0_12, %c0_13, %c0_14] : memref<1x1x8x1xf32, #tpu.memory_space<vmem>>, vector<1x1x8x1xf32>
    %13 = vector.shape_cast %12 : vector<1x1x8x1xf32> to vector<8x1xf32>
    %cst_15 = arith.constant dense<0.000000e+00> : vector<8xf32>
    %14 = vector.multi_reduction <add>, %4, %cst_15 [1] : vector<8x256xf32> to vector<8xf32>
    %15 = vector.shape_cast %14 : vector<8xf32> to vector<8x1xf32>
    %16 = arith.addf %13, %15 : vector<8x1xf32>
    %c0_16 = arith.constant 0 : index
    %c0_17 = arith.constant 0 : index
    %c0_18 = arith.constant 0 : index
    %c0_19 = arith.constant 0 : index
    %17 = vector.load %arg5[%c0_16, %c0_17, %c0_18, %c0_19] : memref<1x1x8x1xf32, #tpu.memory_space<vmem>>, vector<1x1x8x1xf32>
    %18 = vector.shape_cast %17 : vector<1x1x8x1xf32> to vector<8x1xf32>
    %19 = vector.shape_cast %16 : vector<8x1xf32> to vector<1x1x8x1xf32>
    tpu.vector_store %arg5[%c0_16, %c0_17, %c0_18, %c0_19], %19 {strides = array<i32>} : memref<1x1x8x1xf32, #tpu.memory_space<vmem>>, vector<1x1x8x1xf32>,
    return
  }
  func.func @transform_0(%arg0: i32, %arg1: i32, %arg2: i32) -> (i32, i32, i32) {
    %c1_i32 = arith.constant 1 : i32
    %0 = arith.muli %arg1, %c1_i32 : i32
    %1 = arith.addi %0, %arg2 : i32
    %c0_i32 = arith.constant 0 : i32
    %c0_i32_0 = arith.constant 0 : i32
    return %arg0, %c0_i32, %1 : i32, i32, i32
  }
  func.func @transform_1(%arg0: i32, %arg1: i32, %arg2: i32) -> (i32, i32, i32, i32) {
    %c0_i32 = arith.constant 0 : i32
    %c0_i32_0 = arith.constant 0 : i32
    %c0_i32_1 = arith.constant 0 : i32
    return %arg0, %arg1, %c0_i32, %c0_i32_0 : i32, i32, i32, i32
  }
  func.func @transform_2(%arg0: i32, %arg1: i32, %arg2: i32) -> (i32, i32, i32, i32) {
    %c0_i32 = arith.constant 0 : i32
    %c0_i32_0 = arith.constant 0 : i32
    %c0_i32_1 = arith.constant 0 : i32
    return %arg0, %arg1, %c0_i32, %c0_i32_0 : i32, i32, i32, i32
  }
}

module attributes {stable_mosaic.version = 11 : i64} {
  func.func @_out_kernel(%arg0: i32, %arg1: i32, %arg2: memref<1x8x256xf32, #tpu.memory_space<vmem>>, %arg3: memref<1x8x8xf32, #tpu.memory_space<vmem>>, %arg4: memref<1x8x1xf32, #tpu.memory_space<vmem>>, %arg5: memref<1x8x256xf32, #tpu.memory_space<vmem>>) attributes {dimension_semantics = [#tpu.dimension_semantics<parallel>, #tpu.dimension_semantics<parallel>], iteration_bounds = array<i64: 2, 1>, scalar_prefetch = 0 : i64, scratch_operands = 0 : i64, tpu.core_type = #tpu.core_type<tc>, window_params = [{transform_indices = @transform_0, window_bounds = array<i64: 1, 8, 256>}, {transform_indices = @transform_1, window_bounds = array<i64: 1, 8, 8>}, {transform_indices = @transform_2, window_bounds = array<i64: 1, 8, 1>}, {transform_indices = @transform_3, window_bounds = array<i64: 1, 8, 256>}]} {
    %c0 = arith.constant 0 : index
    %c0_0 = arith.constant 0 : index
    %c0_1 = arith.constant 0 : index
    %0 = vector.load %arg2[%c0, %c0_0, %c0_1] : memref<1x8x256xf32, #tpu.memory_space<vmem>>, vector<1x8x256xf32>
    %1 = vector.shape_cast %0 : vector<1x8x256xf32> to vector<8x256xf32>
    %c0_2 = arith.constant 0 : index
    %c0_3 = arith.constant 0 : index
    %c0_4 = arith.constant 0 : index
    %2 = vector.load %arg3[%c0_2, %c0_3, %c0_4] : memref<1x8x8xf32, #tpu.memory_space<vmem>>, vector<1x8x8xf32>
    %3 = vector.shape_cast %2 : vector<1x8x8xf32> to vector<8x8xf32>
    %cst = arith.constant dense<0.000000e+00> : vector<8x256xf32>
    %4 = tpu.matmul %3, %1, %cst {dimension_numbers = #tpu.dot_dimension_numbers<[1], [0], [0], [1], [0, 0, 1, 1], [], []>} : vector<8x8xf32>, vector<8x256xf32>, vector<8x256xf32> -> vector<8x256xf32>
    %c0_5 = arith.constant 0 : index
    %c0_6 = arith.constant 0 : index
    %c0_7 = arith.constant 0 : index
    %5 = vector.load %arg4[%c0_5, %c0_6, %c0_7] : memref<1x8x1xf32, #tpu.memory_space<vmem>>, vector<1x8x1xf32>
    %6 = vector.shape_cast %5 : vector<1x8x1xf32> to vector<8x1xf32>
    %7 = vector.broadcast %6 : vector<8x1xf32> to vector<8x256xf32>
    %8 = arith.addf %4, %7 : vector<8x256xf32>
    %c0_8 = arith.constant 0 : index
    %c0_9 = arith.constant 0 : index
    %c0_10 = arith.constant 0 : index
    %9 = vector.load %arg5[%c0_8, %c0_9, %c0_10] : memref<1x8x256xf32, #tpu.memory_space<vmem>>, vector<1x8x256xf32>
    %10 = vector.shape_cast %9 : vector<1x8x256xf32> to vector<8x256xf32>
    %11 = vector.shape_cast %8 : vector<8x256xf32> to vector<1x8x256xf32>
    tpu.vector_store %arg5[%c0_8, %c0_9, %c0_10], %11 {strides = array<i32>} : memref<1x8x256xf32, #tpu.memory_space<vmem>>, vector<1x8x256xf32>,
    return
  }
  func.func @transform_0(%arg0: i32, %arg1: i32) -> (i32, i32, i32) {
    %c0_i32 = arith.constant 0 : i32
    %c0_i32_0 = arith.constant 0 : i32
    return %arg0, %c0_i32, %arg1 : i32, i32, i32
  }
  func.func @transform_1(%arg0: i32, %arg1: i32) -> (i32, i32, i32) {
    %c0_i32 = arith.constant 0 : i32
    %c0_i32_0 = arith.constant 0 : i32
    %c0_i32_1 = arith.constant 0 : i32
    return %arg0, %c0_i32, %c0_i32_0 : i32, i32, i32
  }
  func.func @transform_2(%arg0: i32, %arg1: i32) -> (i32, i32, i32) {
    %c0_i32 = arith.constant 0 : i32
    %c0_i32_0 = arith.constant 0 : i32
    %c0_i32_1 = arith.constant 0 : i32
    return %arg0, %c0_i32, %c0_i32_0 : i32, i32, i32
  }
  func.func @transform_3(%arg0: i32, %arg1: i32) -> (i32, i32, i32) {
    %c0_i32 = arith.constant 0 : i32
    %c0_i32_0 = arith.constant 0 : i32
    return %arg0, %c0_i32, %arg1 : i32, i32, i32
  }
}

</mosaic_0001>

<bundles_post_ra>
// kernel: relation_nonlocal.3
= control target key start
LH: loop header
LB: loop body
LE: loop exit
PB: predicated region body
PF: predicated region fallthrough
CT: control target
= control target key end

     0   :  { %s498_s12 = smov 0   ;;  %s500_s13 = smov 0   ;;  %s537_s0 = inlined_call_operand.vmem [shape: f32[2,8,256], index: 0, kind: input, shape index: {}]   ;;  %s538_s1 = inlined_call_operand.vmem [shape: f32[2,8,8], index: 1, kind: input, shape index: {}]   ;;  %s539_s2 = inlined_call_operand.vmem [shape: f32[2,8,1], index: 2, kind: input, shape index: {}]   ;;  %s540_s3 = inlined_call_operand.vmem [shape: f32[2,8,256], index: 3, kind: output, shape index: {}]  }
   0x1   :  { %s502_s14 = smov 0  }
   0x2 LB: > { %s25_s15 = sadd.s32 1, %s471_s13  ;;  %p414_p0 = scmp.ge.s32.totalorder %s475_s14, 1  ;;  %s475_s14 = sphi %s502_s14, %s13_s14   ;;  %s471_s13 = sphi %s500_s13, %s542_s13   ;;  %s467_s12 = sphi %s498_s12, %s541_s12  }
   0x3   : > { %p27_p1 = scmp.ge.s32.totalorder %s25_s15, 2  ;;  %p176_p2 = scmp.lt.s32.totalorder %s475_s14, 3 }
   0x5   : > { %s544_s15 = smov (%p27_p1, %s25_s15), 0  ;;  %p177_p3 = pnand %p414_p0, %p176_p2 }
   0x6   : > { %p217_p4 = scmp.lt.s32.totalorder (!%p177_p3), %s467_s12, 1 }
   0x7   : > { %180 = sbr.rel (%p177_p3) target bundleno = 147 (0x93), region = 32 }
   0xc   : > { %v477_v0 = vmov 0   ;;  %s546_s12 = smov (!%p217_p4, %s467_s12), 1  ;;  %vm253_vm0 = vcmask 64512  }
   0xd   : > { %452 = vset.pattern.permute.xlu0 %v477_v0  ;;  %s425_s16 = sshll.u32 %s546_s12, 4  ;;  %s417_s17 = sshll.u32 %s546_s12, 3 }
   0xe   : > { %s224_s20 = scalar_lea.vmem %s537_s0, %s425_s16  ;;  %s229_s23 = scalar_lea.vmem %s538_s1, %s417_s17 }
   0xf   : > { %v244_v1 = vld [vmem:[%s224_s20] sm:$0xff]  ;;  %v245_v2 = vld [vmem:[%s224_s20 + $0x8] sm:$0xff]  ;;  %s233_s26 = scalar_lea.vmem %s539_s2, %s417_s17  ;;  %s242_s29 = scalar_lea.vmem %s540_s3, %s425_s16 }
  0x10   : > { %272 = vmatpush.msra.mxu0 %v244_v1  ;;  %292 = vmatpush.msra.mxu1 %v245_v2  ;;  %v246_v3 = vld [vmem:[%s229_s23] sm:$0xff] }
  0x11   : > { %v247_v4 = vld [vmem:[%s233_s26] sm:$0xff]  ;;  %421 = vmatmul.msk.f32.vlgmr.msra.gmra.mxu0 %vm253_vm0, %v246_v3  ;;  %422 = vmatmul.msk.f32.vlgmr.msra.gmra.mxu1 %vm253_vm0, %v246_v3 }
  0x12   : > { %250 = vperm.xlu0 %452, %v247_v4  }
  0x84   : > { %v251_v5 = vpop.permute.xlu0 %250 }
  0x8e   : > { %v274_v6 = vpop.f32.mrf.mxu0  ;;  %v294_v7 = vpop.f32.mrf.mxu1 }
  0x8f   : > { %v275_v8 = vadd.f32 %v274_v6, %v251_v5  ;;  %v295_v9 = vadd.f32 %v294_v7, %v251_v5 }
  0x91   : > { %297 = vst [vmem:[%s242_s29] sm:$0xff] %v275_v8 }
  0x92   : > { %298 = vst [vmem:[%s242_s29 + $0x8] sm:$0xff] %v295_v9 }
  0x93 PF: > { %s13_s14 = sadd.s32 1, %s475_s14   ;;  %s541_s12 = smov %s471_s13 }
  0x94   : > { %p10_p5 = scmp.ge.s32.totalorder %s13_s14, 4   ;;  %s542_s13 = smov %s544_s15 }
  0x96   :  { %12 = sbr.rel (!%p10_p5) target bundleno = 2 (0x2), region = 68 }

// kernel: relation_nonlocal.2
= control target key start
LH: loop header
LB: loop body
LE: loop exit
PB: predicated region body
PF: predicated region fallthrough
CT: control target
= control target key end

     0   :  { %s470_s9 = smov 0   ;;  %s472_s10 = smov 0   ;;  %s506_s0 = inlined_call_operand.vmem [shape: f32[2,8,256], index: 0, kind: input, shape index: {}]   ;;  %s507_s1 = inlined_call_operand.vmem [shape: f32[2,1,8,8], index: 1, kind: output, shape index: {0}]   ;;  %s508_s2 = inlined_call_operand.vmem [shape: f32[2,1,8,1], index: 2, kind: output, shape index: {1}]  }
   0x1   :  { %s474_s11 = smov 0  }
   0x2 LB: > { %s32_s12 = sadd.s32 1, %s448_s10  ;;  %p397_p0 = scmp.ge.s32.totalorder %s452_s11, 1  ;;  %s452_s11 = sphi %s474_s11, %s13_s11   ;;  %s448_s10 = sphi %s472_s10, %s510_s10   ;;  %s444_s9 = sphi %s470_s9, %s509_s9  }
   0x3   : > { %p34_p1 = scmp.ge.s32.totalorder %s32_s12, 2  ;;  %p149_p2 = scmp.lt.s32.totalorder %s452_s11, 3 }
   0x5   : > { %s512_s12 = smov (%p34_p1, %s32_s12), 0  ;;  %p150_p3 = pnand %p397_p0, %p149_p2 }
   0x6   : > { %p187_p4 = scmp.lt.s32.totalorder (!%p150_p3), %s444_s9, 1 }
   0x7   : > { %153 = sbr.rel (%p150_p3) target bundleno = 150 (0x96), region = 24 }
   0xc   : > { %s514_s9 = smov (!%p187_p4, %s444_s9), 1  ;;  %vm215_vm0 = vcmask 64512   ;;  %vm217_vm1 = vcmask 7168   ;;  %v454_v3 = vmov 0.0  }
   0xd   : > { %s404_s13 = sshll.u32 %s514_s9, 4  ;;  %s400_s17 = sshll.u32 %s514_s9, 3 }
   0xe   : > { %s194_s16 = scalar_lea.vmem %s506_s0, %s404_s13  ;;  %s203_s20 = scalar_lea.vmem %s507_s1, %s400_s17 }
   0xf   : > { %v219_v0 = vld [vmem:[%s194_s16] sm:$0xff]  ;;  %v220_v1 = vld [vmem:[%s194_s16 + $0x8] sm:$0xff]  ;;  %s210_s23 = scalar_lea.vmem %s508_s2, %s400_s17  ;;  %216 = vst.msk [vmem:[%s203_s20] sm:$0xff] %vm215_vm0, %v454_v3 }
  0x10   : > { %237 = vmatpush.xpose.msra.mxu0 %v219_v0  ;;  %257 = vmatpush.xpose.msra.mxu1 %v220_v1  ;;  %v266_v2 = vadd.f32 %v220_v1, %v219_v0  ;;  %218 = vst.msk [vmem:[%s210_s23] sm:$0xff] %vm217_vm1, %v454_v3 }
  0x12   : > { %267 = vadd.xlane.f32.xlu0 %v266_v2 }
  0x13   : > { %238 = vmatmul.f32.vlgmr.msra.gmra.mxu0 %v219_v0  ;;  %258 = vmatmul.f32.vlgmr.msra.gmra.mxu1 %v220_v1 }
  0x16   : > { %v221_v8 = vld [vmem:[%s203_s20] sm:$0xff] }
  0x17   : > { %v265_v4 = vld [vmem:[%s210_s23] sm:$0xff] }
  0x85   : > { %v268_v5 = vpop.xlane.xlu0 %267 }
  0x86   : > { %v269_v6 = vadd.f32 %v268_v5, %v265_v4 }
  0x88   : > { %271 = vst.msk [vmem:[%s210_s23] sm:$0xff] %vm217_vm1, %v269_v6 }
  0x90   : > { %v239_v7 = vpop.f32.mrf.mxu0  ;;  %v259_v9 = vpop.f32.mrf.mxu1 }
  0x91   : > { %v260_v10 = vadd.f32 %v259_v9, %v239_v7 }
  0x93   : > { %v262_v11 = vadd.f32 %v260_v10, %v221_v8 }
  0x95   : > { %264 = vst.msk [vmem:[%s203_s20] sm:$0xff] %vm215_vm0, %v262_v11 }
  0x96 PF: > { %s13_s11 = sadd.s32 1, %s452_s11   ;;  %s509_s9 = smov %s448_s10 }
  0x97   : > { %p10_p5 = scmp.ge.s32.totalorder %s13_s11, 4   ;;  %s510_s10 = smov %s512_s12 }
  0x99   :  { %12 = sbr.rel (!%p10_p5) target bundleno = 2 (0x2), region = 70 }

</bundles_post_ra>
